<compile_context>
chip_gen: v7x
topology: tpu7x:2x2x1
jax: 0.10.0
libtpu: 0.0.40
codegen_flags: <defaults>
</compile_context>

<pallas_src>
import functools

import jax
import jax.numpy as jnp
from jax.experimental import pallas as pl
from jax.experimental.pallas import tpu as pltpu


def _sublane_multiple(dtype):
    """Sublane tiling requirement for second-to-last block dims (8 f32, 16 bf16)."""
    return max(8, 32 // jnp.dtype(dtype).itemsize)


def _pick_tile(n, target, multiple):
    """Largest divisor of n that is <= target and a multiple of `multiple`.

    Falls back to n itself (a full-extent block is always layout-legal)."""
    t = min(n, max(target, multiple))
    t -= t % multiple
    while t >= multiple:
        if n % t == 0:
            return t
        t -= multiple
    return n


def _tpu_defaults():
    """Per-generation tile / VMEM-limit defaults (v7x only has 64 MiB VMEM)."""
    try:
        vmem = pltpu.get_tpu_info().vmem_capacity_bytes
    except Exception:  # non-TPU backend / older jax: assume the small-VMEM case
        vmem = 64 * 1024 * 1024
    if vmem <= 64 * 1024 * 1024:           # v7x-class
        return dict(block_q=256, block_kv=128, block_ln=256,
                    vmem_limit=40 * 1024 * 1024)
    return dict(block_q=512, block_kv=256, block_ln=512,   # v5e / v6e (128 MiB)
                vmem_limit=64 * 1024 * 1024)


def _ln_qkv_kernel(x_ref, w_ref, b_ref, q_ref, k_ref, v_ref, *, inner, eps):
    """LayerNorm (affine pre-folded into w/b) + one wide QKV matmul.

    x_ref: (tn, D); w_ref: (D, 3*inner); b_ref: (1, 3*inner)
    q/k/v_ref: (tn, inner) lane-dense outputs (scale already folded into q).
    """
    x = x_ref[...].astype(jnp.float32)                       # LN math in f32
    mean = jnp.mean(x, axis=-1, keepdims=True)
    var = jnp.mean((x - mean) ** 2, axis=-1, keepdims=True)
    xn = ((x - mean) * jax.lax.rsqrt(var + eps)).astype(x_ref.dtype)
    # Single (tn, D) @ (D, 3*inner) matmul: full MXU output width, f32 accumulate.
    qkv = jnp.dot(xn, w_ref[...], preferred_element_type=jnp.float32)
    qkv = (qkv + b_ref[...].astype(jnp.float32)).astype(q_ref.dtype)
    q_ref[...] = qkv[:, :inner]
    k_ref[...] = qkv[:, inner:2 * inner]
    v_ref[...] = qkv[:, 2 * inner:]


def _flash_attn_proj_kernel(q_ref, k_ref, v_ref, wo_ref, bo_ref, o_ref,
                            m_sc, l_sc, acc_sc, *, heads, dim_head):
    """Online-softmax attention over kv tiles, fused with the output projection.

    q_ref: (tq, inner) pre-scaled queries; k/v_ref: (tk, inner);
    wo_ref: (inner, D); bo_ref: (1, D); o_ref: (tq, D).
    Scratch: m_sc / l_sc (tq, heads) f32, acc_sc (tq, inner) f32.
    """
    kv = pl.program_id(2)

    @pl.when(kv == 0)
    def _():
        m_sc[...] = jnp.full(m_sc.shape, -jnp.inf, dtype=m_sc.dtype)
        l_sc[...] = jnp.zeros(l_sc.shape, dtype=l_sc.dtype)
        acc_sc[...] = jnp.zeros(acc_sc.shape, dtype=acc_sc.dtype)

    # Heads processed one at a time from the lane-dense tiles: bounds the live
    # f32 score transients to a single (tq, tk) per head, and every matmul is a
    # plain 2-D MXU contraction (no batched einsums, no in-kernel transposes).
    for h in range(heads):
        cs = slice(h * dim_head, (h + 1) * dim_head)         # this head's lanes
        q_h = q_ref[:, cs]                                   # (tq, dh)
        k_h = k_ref[:, cs]                                   # (tk, dh)
        s = jax.lax.dot_general(q_h, k_h, (((1,), (1,)), ((), ())),
                                preferred_element_type=jnp.float32)  # (tq, tk)
        m_prev = m_sc[:, h:h + 1]                            # (tq, 1)
        m_new = jnp.maximum(m_prev, jnp.max(s, axis=-1, keepdims=True))
        alpha = jnp.exp(m_prev - m_new)
        p = jnp.exp(s - m_new)
        l_sc[:, h:h + 1] = alpha * l_sc[:, h:h + 1] + jnp.sum(p, axis=-1,
                                                              keepdims=True)
        acc_sc[:, cs] = alpha * acc_sc[:, cs] + jnp.dot(
            p.astype(v_ref.dtype), v_ref[:, cs],
            preferred_element_type=jnp.float32)
        m_sc[:, h:h + 1] = m_new

    @pl.when(kv == pl.num_programs(2) - 1)
    def _():
        # Per-head normalization (EUP approximate reciprocal) written back into
        # the lane-dense accumulator, then ONE (tq, inner) @ (inner, D) matmul.
        for h in range(heads):
            cs = slice(h * dim_head, (h + 1) * dim_head)
            inv_l = pl.reciprocal(l_sc[:, h:h + 1], approx=True)   # (tq, 1)
            acc_sc[:, cs] = acc_sc[:, cs] * inv_l
        attn_out = acc_sc[...].astype(wo_ref.dtype)                # (tq, inner)
        proj = jnp.dot(attn_out, wo_ref[...],
                       preferred_element_type=jnp.float32)         # (tq, D)
        o_ref[...] = (proj + bo_ref[...].astype(jnp.float32)).astype(o_ref.dtype)


def _weight_spec(block_shape, index_map, single_buffer):
    """BlockSpec for weights whose grid index never changes (single buffer)."""
    if single_buffer:
        return pl.BlockSpec(block_shape, index_map, pipeline_mode=pl.Buffered(1))
    return pl.BlockSpec(block_shape, index_map)


def _attention_impl(x, gamma, beta, w_qkv, w_out, b_out, *, heads, dim_head,
                    block_q, block_kv, block_ln, vmem_limit, single_buffer):
    B, N, D = x.shape
    inner = heads * dim_head
    scale = dim_head ** (-0.5)
    eps = 1e-5
    assert w_qkv.shape == (D, 3 * inner) and w_out.shape == (inner, D)

    sub = _sublane_multiple(x.dtype)
    tq = _pick_tile(N, block_q, sub)
    tk = _pick_tile(N, block_kv, sub)
    tn = _pick_tile(N, block_ln, sub)

    f32 = jnp.float32
    # One-time weight prep: fold LayerNorm's gamma (row scale) and beta (bias)
    # and the 1/sqrt(dim_head) scale (q columns) into the QKV weights; cast
    # weights to the activation dtype (f32 accumulation requested in-kernel).
    g = gamma.reshape(1, D).astype(f32)
    bt = beta.reshape(1, D).astype(f32)
    w_f32 = w_qkv.astype(f32)
    w_fold = w_f32 * g.reshape(D, 1)
    b_fold = bt @ w_f32
    w_fold = w_fold.at[:, :inner].multiply(scale)
    b_fold = b_fold.at[:, :inner].multiply(scale)
    w_fold = w_fold.astype(x.dtype)
    b_fold = b_fold.astype(f32)
    w_o = w_out.astype(x.dtype)
    b_o = b_out.reshape(1, D).astype(f32)

    qkv_out = jax.ShapeDtypeStruct((B, N, inner), x.dtype)
    qkv_spec = lambda: pl.BlockSpec((None, tn, inner), lambda b, i: (b, i, 0))

    # ---- Kernel A: LayerNorm + wide QKV projection -> lane-dense q/k/v --------
    q, k, v = pl.pallas_call(
        functools.partial(_ln_qkv_kernel, inner=inner, eps=eps),
        out_shape=[qkv_out, qkv_out, qkv_out],
        grid_spec=pltpu.PrefetchScalarGridSpec(
            num_scalar_prefetch=0,
            grid=(B, N // tn),
            in_specs=[
                pl.BlockSpec((None, tn, D), lambda b, i: (b, i, 0)),          # x
                _weight_spec((D, 3 * inner), lambda b, i: (0, 0), single_buffer),
                _weight_spec((1, 3 * inner), lambda b, i: (0, 0), single_buffer),
            ],
            out_specs=[qkv_spec(), qkv_spec(), qkv_spec()],
        ),
        compiler_params=pltpu.CompilerParams(
            dimension_semantics=("parallel", "parallel"),
            vmem_limit_bytes=vmem_limit),
    )(x, w_fold, b_fold)

    # ---- Kernel B: flash attention + fused output projection -> (B, N, D) -----
    out = pl.pallas_call(
        functools.partial(_flash_attn_proj_kernel, heads=heads, dim_head=dim_head),
        out_shape=jax.ShapeDtypeStruct((B, N, D), x.dtype),
        grid_spec=pltpu.PrefetchScalarGridSpec(
            num_scalar_prefetch=0,
            grid=(B, N // tq, N // tk),
            in_specs=[
                pl.BlockSpec((None, tq, inner), lambda b, i, j: (b, i, 0)),   # q
                pl.BlockSpec((None, tk, inner), lambda b, i, j: (b, j, 0)),   # k
                pl.BlockSpec((None, tk, inner), lambda b, i, j: (b, j, 0)),   # v
                _weight_spec((inner, D), lambda b, i, j: (0, 0), single_buffer),
                _weight_spec((1, D), lambda b, i, j: (0, 0), single_buffer),
            ],
            out_specs=pl.BlockSpec((None, tq, D), lambda b, i, j: (b, i, 0)),
            scratch_shapes=[
                pltpu.VMEM((tq, heads), jnp.float32),   # running max, per head
                pltpu.VMEM((tq, heads), jnp.float32),   # running denom, per head
                pltpu.VMEM((tq, inner), jnp.float32),   # un-normalized attn out
            ],
        ),
        compiler_params=pltpu.CompilerParams(
            dimension_semantics=("parallel", "parallel", "arbitrary"),
            vmem_limit_bytes=vmem_limit),
    )(q, k, v, w_o, b_o)
    return out


def attention_forward(x, gamma, beta, w_qkv, w_out, b_out, *, heads, dim_head,
                      block_q=None, block_kv=None, block_ln=None):
    """Forward pass of the PyTorch `Attention` module (dropout p=0 -> identity)."""
    defaults = _tpu_defaults()
    kwargs = dict(heads=heads, dim_head=dim_head,
                  block_q=block_q or defaults["block_q"],
                  block_kv=block_kv or defaults["block_kv"],
                  block_ln=block_ln or defaults["block_ln"],
                  vmem_limit=defaults["vmem_limit"])
    try:
        # Constant-index weights single-buffered (pl.Buffered(1)) to free VMEM.
        return _attention_impl(x, gamma, beta, w_qkv, w_out, b_out,
                               single_buffer=True, **kwargs)
    except Exception:
        # This jax version rejected pipeline_mode / Buffered(1): fall back to the
        # default double-buffered weight blocks (identical math).
        return _attention_impl(x, gamma, beta, w_qkv, w_out, b_out,
                               single_buffer=False, **kwargs)


def attention_ref(x, gamma, beta, w_qkv, w_out, b_out, *, heads, dim_head):
    """Pure-JAX reference matching the PyTorch module's forward."""
    B, N, D = x.shape
    inner = heads * dim_head
    scale = dim_head ** (-0.5)
    mean = jnp.mean(x, axis=-1, keepdims=True)
    var = jnp.mean((x - mean) ** 2, axis=-1, keepdims=True)
    xn = (x - mean) / jnp.sqrt(var + 1e-5) * gamma.reshape(D) + beta.reshape(D)
    qkv = xn @ w_qkv
    q, k, v = jnp.split(qkv, 3, axis=-1)

    def to_heads(t):
        return t.reshape(B, N, heads, dim_head).transpose(0, 2, 1, 3)

    q, k, v = map(to_heads, (q, k, v))
    dots = jnp.einsum("bhnd,bhmd->bhnm", q, k) * scale
    attn = jax.nn.softmax(dots, axis=-1)
    out = jnp.einsum("bhnm,bhmd->bhnd", attn, v)
    out = out.transpose(0, 2, 1, 3).reshape(B, N, inner)
    return out @ w_out + b_out.reshape(D)


if __name__ == "__main__":
    B, N, D = 2, 8, 32
    heads, dim_head = 4, 16
    inner = heads * dim_head

    key = jax.random.PRNGKey(0)
    kx, kg, kb, kqkv, kwo, kbo = jax.random.split(key, 6)

    x = jax.random.normal(kx, (B, N, D), jnp.float32)
    # Non-trivial LayerNorm affine params to exercise the gamma/beta folding.
    gamma = 1.0 + 0.1 * jax.random.normal(kg, (1, D), jnp.float32)
    beta = 0.1 * jax.random.normal(kb, (1, D), jnp.float32)
    w_qkv = jax.random.normal(kqkv, (D, 3 * inner), jnp.float32) * 0.05
    w_out = jax.random.normal(kwo, (inner, D), jnp.float32) * 0.05
    b_out = jax.random.normal(kbo, (1, D), jnp.float32) * 0.05

    out = attention_forward(x, gamma, beta, w_qkv, w_out, b_out,
                            heads=heads, dim_head=dim_head)
    out = jax.block_until_ready(out)

    ref = attention_ref(x, gamma, beta, w_qkv, w_out, b_out,
                        heads=heads, dim_head=dim_head)
    assert out.shape == (B, N, D)
    # Tolerance covers the EUP approximate reciprocal in the softmax denominator.
    assert jnp.allclose(out, ref, atol=1e-2, rtol=1e-2), "mismatch vs reference"
    print("KERNEL_OK")
</pallas_src>

<mosaic_0001>
module attributes {stable_mosaic.version = 11 : i64} {
  func.func @_ln_qkv_kernel(%arg0: i32, %arg1: i32, %arg2: memref<1x8x32xf32, #tpu.memory_space<vmem>>, %arg3: memref<32x192xf32, #tpu.memory_space<vmem>>, %arg4: memref<1x192xf32, #tpu.memory_space<vmem>>, %arg5: memref<1x8x64xf32, #tpu.memory_space<vmem>>, %arg6: memref<1x8x64xf32, #tpu.memory_space<vmem>>, %arg7: memref<1x8x64xf32, #tpu.memory_space<vmem>>) attributes {dimension_semantics = [#tpu.dimension_semantics<parallel>, #tpu.dimension_semantics<parallel>], iteration_bounds = array<i64: 2, 1>, scalar_prefetch = 0 : i64, scratch_operands = 0 : i64, tpu.core_type = #tpu.core_type<tc>, window_params = [{transform_indices = @transform_0, window_bounds = array<i64: 1, 8, 32>}, {pipeline_mode = #tpu.pipeline_mode<synchronous>, transform_indices = @transform_1, window_bounds = array<i64: 32, 192>}, {pipeline_mode = #tpu.pipeline_mode<synchronous>, transform_indices = @transform_2, window_bounds = array<i64: 1, 192>}, {transform_indices = @transform_3, window_bounds = array<i64: 1, 8, 64>}, {transform_indices = @transform_4, window_bounds = array<i64: 1, 8, 64>}, {transform_indices = @transform_5, window_bounds = array<i64: 1, 8, 64>}]} {
    %c0 = arith.constant 0 : index
    %c0_0 = arith.constant 0 : index
    %c0_1 = arith.constant 0 : index
    %0 = vector.load %arg2[%c0, %c0_0, %c0_1] : memref<1x8x32xf32, #tpu.memory_space<vmem>>, vector<1x8x32xf32>
    %1 = vector.shape_cast %0 : vector<1x8x32xf32> to vector<8x32xf32>
    %cst = arith.constant dense<0.000000e+00> : vector<8xf32>
    %2 = vector.multi_reduction <add>, %1, %cst [1] : vector<8x32xf32> to vector<8xf32>
    %3 = vector.shape_cast %2 : vector<8xf32> to vector<8x1xf32>
    %cst_2 = arith.constant 3.200000e+01 : f32
    %4 = vector.broadcast %cst_2 : f32 to vector<8x1xf32>
    %5 = arith.divf %3, %4 : vector<8x1xf32>
    %6 = vector.broadcast %5 : vector<8x1xf32> to vector<8x32xf32>
    %7 = arith.subf %1, %6 : vector<8x32xf32>
    %8 = arith.mulf %7, %7 : vector<8x32xf32>
    %cst_3 = arith.constant dense<0.000000e+00> : vector<8xf32>
    %9 = vector.multi_reduction <add>, %8, %cst_3 [1] : vector<8x32xf32> to vector<8xf32>
    %10 = vector.shape_cast %9 : vector<8xf32> to vector<8x1xf32>
    %cst_4 = arith.constant 3.200000e+01 : f32
    %11 = vector.broadcast %cst_4 : f32 to vector<8x1xf32>
    %12 = arith.divf %10, %11 : vector<8x1xf32>
    %13 = vector.broadcast %5 : vector<8x1xf32> to vector<8x32xf32>
    %14 = arith.subf %1, %13 : vector<8x32xf32>
    %cst_5 = arith.constant 9.99999974E-6 : f32
    %15 = vector.broadcast %cst_5 : f32 to vector<8x1xf32>
    %16 = arith.addf %12, %15 : vector<8x1xf32>
    %17 = math.rsqrt %16 : vector<8x1xf32>
    %18 = vector.broadcast %17 : vector<8x1xf32> to vector<8x32xf32>
    %19 = arith.mulf %14, %18 : vector<8x32xf32>
    %c0_6 = arith.constant 0 : index
    %c0_7 = arith.constant 0 : index
    %20 = vector.load %arg3[%c0_6, %c0_7] : memref<32x192xf32, #tpu.memory_space<vmem>>, vector<32x192xf32>
    %cst_8 = arith.constant dense<0.000000e+00> : vector<8x192xf32>
    %21 = tpu.matmul %19, %20, %cst_8 {dimension_numbers = #tpu.dot_dimension_numbers<[1], [0], [0], [1], [0, 0, 1, 1], [], []>} : vector<8x32xf32>, vector<32x192xf32>, vector<8x192xf32> -> vector<8x192xf32>
    %c0_9 = arith.constant 0 : index
    %c0_10 = arith.constant 0 : index
    %22 = vector.load %arg4[%c0_9, %c0_10] : memref<1x192xf32, #tpu.memory_space<vmem>>, vector<1x192xf32>
    %23 = vector.broadcast %22 : vector<1x192xf32> to vector<8x192xf32>
    %24 = arith.addf %21, %23 : vector<8x192xf32>
    %25 = vector.extract_strided_slice %24 {offsets = [0, 0], sizes = [8, 64], strides = [1, 1]} : vector<8x192xf32> to vector<8x64xf32>
    %c0_11 = arith.constant 0 : index
    %c0_12 = arith.constant 0 : index
    %c0_13 = arith.constant 0 : index
    %26 = vector.load %arg5[%c0_11, %c0_12, %c0_13] : memref<1x8x64xf32, #tpu.memory_space<vmem>>, vector<1x8x64xf32>
    %27 = vector.shape_cast %26 : vector<1x8x64xf32> to vector<8x64xf32>
    %28 = vector.shape_cast %25 : vector<8x64xf32> to vector<1x8x64xf32>
    tpu.vector_store %arg5[%c0_11, %c0_12, %c0_13], %28 {strides = array<i32>} : memref<1x8x64xf32, #tpu.memory_space<vmem>>, vector<1x8x64xf32>,
    %29 = vector.extract_strided_slice %24 {offsets = [0, 64], sizes = [8, 64], strides = [1, 1]} : vector<8x192xf32> to vector<8x64xf32>
    %c0_14 = arith.constant 0 : index
    %c0_15 = arith.constant 0 : index
    %c0_16 = arith.constant 0 : index
    %30 = vector.load %arg6[%c0_14, %c0_15, %c0_16] : memref<1x8x64xf32, #tpu.memory_space<vmem>>, vector<1x8x64xf32>
    %31 = vector.shape_cast %30 : vector<1x8x64xf32> to vector<8x64xf32>
    %32 = vector.shape_cast %29 : vector<8x64xf32> to vector<1x8x64xf32>
    tpu.vector_store %arg6[%c0_14, %c0_15, %c0_16], %32 {strides = array<i32>} : memref<1x8x64xf32, #tpu.memory_space<vmem>>, vector<1x8x64xf32>,
    %33 = vector.extract_strided_slice %24 {offsets = [0, 128], sizes = [8, 64], strides = [1, 1]} : vector<8x192xf32> to vector<8x64xf32>
    %c0_17 = arith.constant 0 : index
    %c0_18 = arith.constant 0 : index
    %c0_19 = arith.constant 0 : index
    %34 = vector.load %arg7[%c0_17, %c0_18, %c0_19] : memref<1x8x64xf32, #tpu.memory_space<vmem>>, vector<1x8x64xf32>
    %35 = vector.shape_cast %34 : vector<1x8x64xf32> to vector<8x64xf32>
    %36 = vector.shape_cast %33 : vector<8x64xf32> to vector<1x8x64xf32>
    tpu.vector_store %arg7[%c0_17, %c0_18, %c0_19], %36 {strides = array<i32>} : memref<1x8x64xf32, #tpu.memory_space<vmem>>, vector<1x8x64xf32>,
    return
  }
  func.func @transform_0(%arg0: i32, %arg1: i32) -> (i32, i32, i32) {
    %c0_i32 = arith.constant 0 : i32
    %c0_i32_0 = arith.constant 0 : i32
    return %arg0, %arg1, %c0_i32 : i32, i32, i32
  }
  func.func @transform_1(%arg0: i32, %arg1: i32) -> (i32, i32) {
    %c0_i32 = arith.constant 0 : i32
    %c0_i32_0 = arith.constant 0 : i32
    %c0_i32_1 = arith.constant 0 : i32
    return %c0_i32, %c0_i32_0 : i32, i32
  }
  func.func @transform_2(%arg0: i32, %arg1: i32) -> (i32, i32) {
    %c0_i32 = arith.constant 0 : i32
    %c0_i32_0 = arith.constant 0 : i32
    %c0_i32_1 = arith.constant 0 : i32
    return %c0_i32, %c0_i32_0 : i32, i32
  }
  func.func @transform_3(%arg0: i32, %arg1: i32) -> (i32, i32, i32) {
    %c0_i32 = arith.constant 0 : i32
    %c0_i32_0 = arith.constant 0 : i32
    return %arg0, %arg1, %c0_i32 : i32, i32, i32
  }
  func.func @transform_4(%arg0: i32, %arg1: i32) -> (i32, i32, i32) {
    %c0_i32 = arith.constant 0 : i32
    %c0_i32_0 = arith.constant 0 : i32
    return %arg0, %arg1, %c0_i32 : i32, i32, i32
  }
  func.func @transform_5(%arg0: i32, %arg1: i32) -> (i32, i32, i32) {
    %c0_i32 = arith.constant 0 : i32
    %c0_i32_0 = arith.constant 0 : i32
    return %arg0, %arg1, %c0_i32 : i32, i32, i32
  }
}

module attributes {stable_mosaic.version = 11 : i64} {
  func.func @_ln_qkv_kernel(%arg0: i32, %arg1: i32, %arg2: memref<1x8x32xf32, #tpu.memory_space<vmem>>, %arg3: memref<32x192xf32, #tpu.memory_space<vmem>>, %arg4: memref<1x192xf32, #tpu.memory_space<vmem>>, %arg5: memref<1x8x64xf32, #tpu.memory_space<vmem>>, %arg6: memref<1x8x64xf32, #tpu.memory_space<vmem>>, %arg7: memref<1x8x64xf32, #tpu.memory_space<vmem>>) attributes {dimension_semantics = [#tpu.dimension_semantics<parallel>, #tpu.dimension_semantics<parallel>], iteration_bounds = array<i64: 2, 1>, scalar_prefetch = 0 : i64, scratch_operands = 0 : i64, tpu.core_type = #tpu.core_type<tc>, window_params = [{transform_indices = @transform_0, window_bounds = array<i64: 1, 8, 32>}, {pipeline_mode = #tpu.pipeline_mode<synchronous>, transform_indices = @transform_1, window_bounds = array<i64: 32, 192>}, {pipeline_mode = #tpu.pipeline_mode<synchronous>, transform_indices = @transform_2, window_bounds = array<i64: 1, 192>}, {transform_indices = @transform_3, window_bounds = array<i64: 1, 8, 64>}, {transform_indices = @transform_4, window_bounds = array<i64: 1, 8, 64>}, {transform_indices = @transform_5, window_bounds = array<i64: 1, 8, 64>}]} {
    %c0 = arith.constant 0 : index
    %c0_0 = arith.constant 0 : index
    %c0_1 = arith.constant 0 : index
    %0 = vector.load %arg2[%c0, %c0_0, %c0_1] : memref<1x8x32xf32, #tpu.memory_space<vmem>>, vector<1x8x32xf32>
    %1 = vector.shape_cast %0 : vector<1x8x32xf32> to vector<8x32xf32>
    %cst = arith.constant dense<0.000000e+00> : vector<8xf32>
    %2 = vector.multi_reduction <add>, %1, %cst [1] : vector<8x32xf32> to vector<8xf32>
    %3 = vector.shape_cast %2 : vector<8xf32> to vector<8x1xf32>
    %cst_2 = arith.constant 3.200000e+01 : f32
    %4 = vector.broadcast %cst_2 : f32 to vector<8x1xf32>
    %5 = arith.divf %3, %4 : vector<8x1xf32>
    %6 = vector.broadcast %5 : vector<8x1xf32> to vector<8x32xf32>
    %7 = arith.subf %1, %6 : vector<8x32xf32>
    %8 = arith.mulf %7, %7 : vector<8x32xf32>
    %cst_3 = arith.constant dense<0.000000e+00> : vector<8xf32>
    %9 = vector.multi_reduction <add>, %8, %cst_3 [1] : vector<8x32xf32> to vector<8xf32>
    %10 = vector.shape_cast %9 : vector<8xf32> to vector<8x1xf32>
    %cst_4 = arith.constant 3.200000e+01 : f32
    %11 = vector.broadcast %cst_4 : f32 to vector<8x1xf32>
    %12 = arith.divf %10, %11 : vector<8x1xf32>
    %13 = vector.broadcast %5 : vector<8x1xf32> to vector<8x32xf32>
    %14 = arith.subf %1, %13 : vector<8x32xf32>
    %cst_5 = arith.constant 9.99999974E-6 : f32
    %15 = vector.broadcast %cst_5 : f32 to vector<8x1xf32>
    %16 = arith.addf %12, %15 : vector<8x1xf32>
    %17 = math.rsqrt %16 : vector<8x1xf32>
    %18 = vector.broadcast %17 : vector<8x1xf32> to vector<8x32xf32>
    %19 = arith.mulf %14, %18 : vector<8x32xf32>
    %c0_6 = arith.constant 0 : index
    %c0_7 = arith.constant 0 : index
    %20 = vector.load %arg3[%c0_6, %c0_7] : memref<32x192xf32, #tpu.memory_space<vmem>>, vector<32x192xf32>
    %cst_8 = arith.constant dense<0.000000e+00> : vector<8x192xf32>
    %21 = tpu.matmul %19, %20, %cst_8 {dimension_numbers = #tpu.dot_dimension_numbers<[1], [0], [0], [1], [0, 0, 1, 1], [], []>} : vector<8x32xf32>, vector<32x192xf32>, vector<8x192xf32> -> vector<8x192xf32>
    %c0_9 = arith.constant 0 : index
    %c0_10 = arith.constant 0 : index
    %22 = vector.load %arg4[%c0_9, %c0_10] : memref<1x192xf32, #tpu.memory_space<vmem>>, vector<1x192xf32>
    %23 = vector.broadcast %22 : vector<1x192xf32> to vector<8x192xf32>
    %24 = arith.addf %21, %23 : vector<8x192xf32>
    %25 = vector.extract_strided_slice %24 {offsets = [0, 0], sizes = [8, 64], strides = [1, 1]} : vector<8x192xf32> to vector<8x64xf32>
    %c0_11 = arith.constant 0 : index
    %c0_12 = arith.constant 0 : index
    %c0_13 = arith.constant 0 : index
    %26 = vector.load %arg5[%c0_11, %c0_12, %c0_13] : memref<1x8x64xf32, #tpu.memory_space<vmem>>, vector<1x8x64xf32>
    %27 = vector.shape_cast %26 : vector<1x8x64xf32> to vector<8x64xf32>
    %28 = vector.shape_cast %25 : vector<8x64xf32> to vector<1x8x64xf32>
    tpu.vector_store %arg5[%c0_11, %c0_12, %c0_13], %28 {strides = array<i32>} : memref<1x8x64xf32, #tpu.memory_space<vmem>>, vector<1x8x64xf32>,
    %29 = vector.extract_strided_slice %24 {offsets = [0, 64], sizes = [8, 64], strides = [1, 1]} : vector<8x192xf32> to vector<8x64xf32>
    %c0_14 = arith.constant 0 : index
    %c0_15 = arith.constant 0 : index
    %c0_16 = arith.constant 0 : index
    %30 = vector.load %arg6[%c0_14, %c0_15, %c0_16] : memref<1x8x64xf32, #tpu.memory_space<vmem>>, vector<1x8x64xf32>
    %31 = vector.shape_cast %30 : vector<1x8x64xf32> to vector<8x64xf32>
    %32 = vector.shape_cast %29 : vector<8x64xf32> to vector<1x8x64xf32>
    tpu.vector_store %arg6[%c0_14, %c0_15, %c0_16], %32 {strides = array<i32>} : memref<1x8x64xf32, #tpu.memory_space<vmem>>, vector<1x8x64xf32>,
    %33 = vector.extract_strided_slice %24 {offsets = [0, 128], sizes = [8, 64], strides = [1, 1]} : vector<8x192xf32> to vector<8x64xf32>
    %c0_17 = arith.constant 0 : index
    %c0_18 = arith.constant 0 : index
    %c0_19 = arith.constant 0 : index
    %34 = vector.load %arg7[%c0_17, %c0_18, %c0_19] : memref<1x8x64xf32, #tpu.memory_space<vmem>>, vector<1x8x64xf32>
    %35 = vector.shape_cast %34 : vector<1x8x64xf32> to vector<8x64xf32>
    %36 = vector.shape_cast %33 : vector<8x64xf32> to vector<1x8x64xf32>
    tpu.vector_store %arg7[%c0_17, %c0_18, %c0_19], %36 {strides = array<i32>} : memref<1x8x64xf32, #tpu.memory_space<vmem>>, vector<1x8x64xf32>,
    return
  }
  func.func @transform_0(%arg0: i32, %arg1: i32) -> (i32, i32, i32) {
    %c0_i32 = arith.constant 0 : i32
    %c0_i32_0 = arith.constant 0 : i32
    return %arg0, %arg1, %c0_i32 : i32, i32, i32
  }
  func.func @transform_1(%arg0: i32, %arg1: i32) -> (i32, i32) {
    %c0_i32 = arith.constant 0 : i32
    %c0_i32_0 = arith.constant 0 : i32
    %c0_i32_1 = arith.constant 0 : i32
    return %c0_i32, %c0_i32_0 : i32, i32
  }
  func.func @transform_2(%arg0: i32, %arg1: i32) -> (i32, i32) {
    %c0_i32 = arith.constant 0 : i32
    %c0_i32_0 = arith.constant 0 : i32
    %c0_i32_1 = arith.constant 0 : i32
    return %c0_i32, %c0_i32_0 : i32, i32
  }
  func.func @transform_3(%arg0: i32, %arg1: i32) -> (i32, i32, i32) {
    %c0_i32 = arith.constant 0 : i32
    %c0_i32_0 = arith.constant 0 : i32
    return %arg0, %arg1, %c0_i32 : i32, i32, i32
  }
  func.func @transform_4(%arg0: i32, %arg1: i32) -> (i32, i32, i32) {
    %c0_i32 = arith.constant 0 : i32
    %c0_i32_0 = arith.constant 0 : i32
    return %arg0, %arg1, %c0_i32 : i32, i32, i32
  }
  func.func @transform_5(%arg0: i32, %arg1: i32) -> (i32, i32, i32) {
    %c0_i32 = arith.constant 0 : i32
    %c0_i32_0 = arith.constant 0 : i32
    return %arg0, %arg1, %c0_i32 : i32, i32, i32
  }
}

</mosaic_0001>

<bundles_post_ra>
// kernel: tpu_custom_call.1
= control target key start
LH: loop header
LB: loop body
LE: loop exit
PB: predicated region body
PF: predicated region fallthrough
CT: control target
= control target key end

     0   :  { %11 = vsyncpa [#allocation3], 0  ;;  %s1277_s0 = inlined_call_operand.hbm [shape: f32[2,8,32], index: 0, kind: input, shape index: {}]   ;;  %s1278_s1 = inlined_call_operand.hbm [shape: f32[32,192], index: 1, kind: input, shape index: {}]   ;;  %s1279_s2 = inlined_call_operand.vmem [shape: f32[1,192], index: 2, kind: input, shape index: {}]   ;;  %s1280_s3 = inlined_call_operand.hbm [shape: f32[2,8,64], index: 3, kind: output, shape index: {0}]   ;;  %s1281_s4 = inlined_call_operand.hbm [shape: f32[2,8,64], index: 4, kind: output, shape index: {1}]   ;;  %s1282_s5 = inlined_call_operand.hbm [shape: f32[2,8,64], index: 5, kind: output, shape index: {2}]  }
   0x1   :  { %13 = vsyncpa [#allocation3 + $0x1], 0 }
   0x2   :  { %14 = vsyncpa [#allocation6], 0 }
   0x3   :  { %15 = vsyncpa [#allocation4], 0 }
   0x4   :  { %17 = vsyncpa [#allocation4 + $0x1], 0 }
   0x5   :  { %18 = vsyncpa [#allocation9], 0 }
   0x6   :  { %20 = vsyncpa [#allocation9 + $0x1], 0  ;;  %s982_s18 = smov 0   ;;  %s984_s19 = smov 0  }
   0x7   :  { %s986_s20 = smov 0   ;;  %s988_s21 = smov 0  }
   0x8   :  { %s990_s22 = smov 0   ;;  %s992_s23 = smov 0  }
   0x9 LB: > { %s1013_s24 = sadd.s32 4294967295, %s941_s23   ;;  %s1286_s25 = sadd.s32 4294967294, %s941_s23   ;;  %s941_s23 = sphi %s992_s23, %s26_s23   ;;  %s937_s22 = sphi %s990_s22, %s1306_s22   ;;  %s933_s21 = sphi %s988_s21, %s1305_s21   ;;  %s929_s20 = sphi %s986_s20, %s1304_s20   ;;  %s925_s19 = sphi %s984_s19, %s1303_s19   ;;  %s921_s18 = sphi %s982_s18, %s1302_s18  }
   0xa   : > { %p60_p0 = scmp.ne.s32.totalorder %s925_s19, %s921_s18  ;;  %p1283_p1 = scmp.eq.s32.totalorder %s1013_s24, 0 }
   0xb   : > { %p134_p3 = scmp.eq.s32.totalorder %s1286_s25, 1  ;;  %p620_p5 = scmp.ge.s32.totalorder %s941_s23, 1 }
   0xc   : > { %p1024_p4 = por %p1283_p1, %p60_p0  ;;  %p197_p7 = scmp.lt.s32.totalorder %s941_s23, 3 }
   0xd   : > { %p1029_p6 = por %p134_p3, %p60_p0  ;;  %s943_s29 = smov [#allocation5]  }
   0xe   : > { %s1287_s26 = scalar_select %p1024_p4, 1, 0 }
   0xf   : > { %s1288_s27 = scalar_select %p1029_p6, 1, 0 }
  0x10   : > { %p1034_p8 = pnand %p620_p5, %p197_p7  ;;  %s209_s30 = sshll.u32 %s943_s29, 4  ;;  %s210_s30 = int_to_ptr.vmem [resolvable:$true] %s209_s30 }
  0x11   : > { %s38_s7 = sadd.s32 1, %s937_s22  ;;  %s737_s10 = scalar_lea.hbm %s1278_s1, 1024 }
  0x12   : > { %s1289_s28 = scalar_select %p1034_p8, 1, 0 }
  0x13   : > { %p660_p9 = pneg %p1034_p8  ;;  %p738_p12 = scmp.ne.s32.totalorder %s1278_s1, %s737_s10 }
  0x14   : > { %p744_p5 = scmp.lt.u32.totalorder %s737_s10, %s1278_s1 }
  0x15   : > { %p1043_p11 = pnand %p660_p9, %p1283_p1 }
  0x17   : > { %p739_p13 = pneg %p1043_p11 }
  0x19   : > { %p740_p0 = pnand %p739_p13, %p738_p12 }
  0x1b   : > { %p741_p3 = pneg %p740_p0 }
  0x1d   : > { %p746_p7 = pnand %p744_p5, %p741_p3 }
  0x1f   : > { %749 = shalt.err (!%p746_p7)
}
  0x20   : > { %s750_s15 = scalar_lea.vmem %s210_s30, 1024  ;;  %p758_p2 = scmp.lt.s32.totalorder %s210_s30, %s210_s30 }
  0x21   : > { %p751_p9 = scmp.ne.s32.totalorder %s210_s30, %s750_s15  ;;  %p759_p6 = scmp.lt.s32.totalorder %s750_s15, %s750_s15 }
  0x23   : > { %p753_p10 = pnand %p751_p9, %p739_p13  ;;  %p760_p4 = por %p759_p6, %p758_p2 }
  0x25   : > { %p754_p1 = pneg %p753_p10 }
  0x27   : > { %p761_p8 = pnand %p760_p4, %p754_p1 }
  0x29   : > { %764 = shalt.err (!%p761_p8)
}
  0x2a   : > { %s944_s16 = smov 256   ;;  %s945_s17 = smov 16  }
  0x2b   : > { %663 = dma.hbm_to_vmem [thread:$0]  (!%p1043_p11), %s1278_s1, 1024, %s210_s30, [#allocation6], %s944_s16, %s944_s16, %s945_s17  }
  0x2c   : > { %p40_p1 = scmp.ge.s32.totalorder %s38_s7, 2  ;;  %s47_s9 = sadd.s32 1, %s929_s20 }
  0x2d   : > { %p54_p2 = scmp.ne.s32.totalorder %s929_s20, %s925_s19  ;;  %p55_p4 = scmp.eq.s32.totalorder %s941_s23, 0 }
  0x2e   : > { %s1308_s7 = smov (%p40_p1, %s38_s7), 0  ;;  %p1292_p8 = scmp.eq.s32.totalorder %s1013_s24, 1 }
  0x2f   : > { %p1070_p6 = por %p55_p4, %p54_p2  ;;  %s42_s6 = ssub.s32 %s937_s22, %s1308_s7 }
  0x30   : > { %p1076_p10 = por %p1292_p8, %p54_p2  ;;  %p679_p12 = scmp.lt.s32.totalorder %s941_s23, 2 }
  0x31   : > { %p45_p11 = scmp.eq.s32.totalorder %s42_s6, 0  ;;  %s226_s30 = sand.u32 1, %s929_s20  }
  0x32   : > { %s623_s12 = sshll.u32 %s226_s30, 3  ;;  %s624_s14 = sshll.u32 %s937_s22, 7 }
  0x33   : > { %s1085_s13 = scalar_select %p45_p11, %s929_s20, %s47_s9  }
  0x34   : > { %s1091_s17 = scalar_lea.hbm %s1277_s0, %s624_s14  ;;  %s230_s29 = scalar_lea.vmem [#allocation2], %s623_s12 }
  0x35   : > { %s238_s8 = sshll.u32 %s230_s29, 4  ;;  %p1097_p13 = pnand %p679_p12, %p1070_p6  ;;  %s1093_s8 = int_to_ptr.vmem [resolvable:$true] %s238_s8 }
  0x36   : > { %s227_s9 = scalar_lea.sflag [#allocation3], %s226_s30  ;;  %s765_s25 = scalar_lea.hbm %s1091_s17, 128 }
  0x37   : > { %p766_p0 = scmp.ne.s32.totalorder %s1091_s17, %s765_s25  ;;  %p767_p3 = pneg %p1097_p13 }
  0x38   : > { %s770_s15 = scalar_lea.hbm %s1277_s0, 256  ;;  %p771_p9 = scmp.lt.u32.totalorder %s1091_s17, %s1277_s0 }
  0x39   : > { %p768_p5 = pnand %p767_p3, %p766_p0  ;;  %p772_p1 = scmp.lt.u32.totalorder %s770_s15, %s765_s25 }
  0x3a   : > { %p774_p4 = scmp.lt.u32.totalorder %s765_s25, %s1091_s17 }
  0x3b   : > { %p769_p7 = pneg %p768_p5  ;;  %p773_p2 = por %p772_p1, %p771_p9 }
  0x3d   : > { %p775_p6 = por %p774_p4, %p773_p2 }
  0x3f   : > { %p776_p8 = pnand %p775_p6, %p769_p7 }
  0x41   : > { %779 = shalt.err (!%p776_p8)
}
  0x42   : > { %s780_s30 = scalar_lea.vmem %s1093_s8, 128  ;;  %s946_s29 = smov [#allocation2]  }
  0x43   : > { %p781_p12 = scmp.ne.s32.totalorder %s1093_s8, %s780_s30  ;;  %s785_s12 = sshll.u32 %s946_s29, 4  ;;  %s786_s12 = int_to_ptr.vmem [resolvable:$false] %s785_s12 }
  0x44   : > { %s787_s14 = scalar_lea.vmem %s786_s12, 256  ;;  %p788_p5 = scmp.lt.s32.totalorder %s1093_s8, %s786_s12 }
  0x45   : > { %p783_p11 = pnand %p781_p12, %p767_p3  ;;  %p789_p9 = scmp.lt.s32.totalorder %s787_s14, %s780_s30 }
  0x47   : > { %p784_p0 = pneg %p783_p11  ;;  %p790_p1 = por %p789_p9, %p788_p5 }
  0x49   : > { %p791_p2 = pnand %p790_p1, %p784_p0 }
  0x4b   : > { %794 = shalt.err (!%p791_p2)
}
  0x4c   : > { %667 = dma.hbm_to_vmem [thread:$0]  (!%p1097_p13), %s1091_s17, 128, %s1093_s8, %s227_s9  }
  0x4d   : > { %p1295_p7 = scmp.ne.s32.totalorder %s1289_s28, 0 }
  0x4e   : > { %s1129_s25 = sand.u32 (!%p1295_p7), 1, %s925_s19   ;;  %p1296_p3 = scmp.ne.s32.totalorder (!%p1295_p7), %s1287_s26, 0 }
  0x4f   : > { %247 = sbr.rel (%p1295_p7) target bundleno = 765 (0x2fd), region = 32  ;;  %s1132_s15 = sshll.u32 (!%p1295_p7), %s1129_s25, 3 }
  0x50   : > { %s250_s10 = scalar_lea.sflag (!%p1295_p7), [#allocation3], %s1129_s25  ;;  %s253_s16 = scalar_lea.vmem (!%p1295_p7), [#allocation2], %s1132_s15 }
  0x56   : > { %904 = dma.done.wait (%p1296_p3), %s250_s10, 128  }
  0x57   : > { %906 = vsyncadd (%p1296_p3), %s250_s10, 4294967168  ;;  %p1297_p13 = scmp.eq.s32.totalorder %s1013_s24, 0 }
  0x59   : > { %908 = dma.done.wait (%p1297_p13), [#allocation6], 1024   ;;  %p1298_p4 = pmov %p1297_p13 }
  0x5a   : > { %vm295_vm0 = vcmask 261120   ;;  %v294_v0 = vld [vmem:[%s253_s16] sm:$0xff]  ;;  %v311_v7 = vld [vmem:[#allocation5 + $0x8] sm:$0xff]  ;;  %v310_v9 = vld [vmem:[#allocation5] sm:$0xff]  ;;  %v947_v14 = vmov 0.0   ;;  %v320_v25 = vlaneseq  ;;  %s1151_s17 = sshll.u32 %s933_s21, 7 }
  0x5b   : > { %910 = vsyncadd (%p1298_p4), [#allocation6], 4294966272  ;;  %v296_v1 = vsel %vm295_vm0, %v294_v0, 0.0  ;;  %v313_v8 = vld [vmem:[#allocation5 + $0x18] sm:$0xff]  ;;  %v312_v11 = vld [vmem:[#allocation5 + $0x10] sm:$0xff]  ;;  %397 = vmatprep.mubr.f32.mxu0 %v947_v14  ;;  %s279_s8 = scalar_lea.vmem [#allocation7], %s1132_s15  ;;  %s1158_s29 = scalar_lea.hbm %s1280_s3, %s1151_s17 }
  0x5c   : > { %297 = vadd.xlane.f32.xlu0 %v296_v1  ;;  %v640_v10 = vpack.c.bf16 %v313_v8, %v311_v7  ;;  %v315_v12 = vld [vmem:[#allocation5 + $0x28] sm:$0xff]  ;;  %v317_v13 = vld [vmem:[#allocation5 + $0x38] sm:$0xff]  ;;  %v642_v15 = vpack.c.bf16 %v312_v11, %v310_v9  ;;  %v314_v17 = vld [vmem:[#allocation5 + $0x20] sm:$0xff]  ;;  %v321_v26 = vshrl.u32 %v320_v25, 7  ;;  %s437_s6 = sshll.u32 %s279_s8, 4  ;;  %vm404_vm1 = vcmask 523264   ;;  %s1160_s6 = int_to_ptr.vmem [resolvable:$true] %s437_s6 }
  0x5d   : > { %v644_v16 = vpack.c.bf16 %v317_v13, %v315_v12  ;;  %v316_v18 = vld [vmem:[#allocation5 + $0x30] sm:$0xff]  ;;  %s948_s21 = smov 64   ;;  %s413_s12 = scalar_lea.sflag [#allocation4], %s1129_s25 }
  0x5e   : > { %641 = vmatprep.subr.bf16.mxu0 %v640_v10  ;;  %v646_v19 = vpack.c.bf16 %v316_v18, %v314_v17  ;;  %v322_v27 = vsub.s32 0, %v321_v26  ;;  %v318_v28 = vld [vmem:[%s1279_s2] sm:$0x3]  ;;  %v326_v29 = vsub.s32 1, %v321_v26  ;;  %s795_s14 = scalar_lea.vmem %s1160_s6, 128  ;;  %s949_s10 = smov [#allocation7]  }
  0x5f   : > { %643 = vmatpush1.bf16.msra.mxu0 %v642_v15  ;;  %p796_p6 = scmp.ne.s32.totalorder %s1160_s6, %s795_s14  ;;  %s799_s16 = sshll.u32 %s949_s10, 4  ;;  %s800_s16 = int_to_ptr.vmem [resolvable:$false] %s799_s16 }
  0x60   : > { %645 = vmatprep.subr.bf16.mxu0 %v644_v16  ;;  %v323_v30 = vrot.slane %v318_v28, %v322_v27  ;;  %v327_v31 = vrot.slane %v318_v28, %v326_v29  ;;  %s801_s26 = scalar_lea.vmem %s800_s16, 256  ;;  %p802_p11 = scmp.lt.s32.totalorder %s1160_s6, %s800_s16 }
  0x61   : > { %p797_p8 = pnand %p796_p6, %p1076_p10  ;;  %p803_p0 = scmp.lt.s32.totalorder %s801_s26, %s795_s14 }
  0x63   : > { %647 = vmatpush1.bf16.msra.mxu0 %v646_v19  ;;  %p798_p12 = pneg %p797_p8  ;;  %p804_p5 = por %p803_p0, %p802_p11 }
  0x65   : > { %p805_p9 = pnand %p804_p5, %p798_p12 }
  0xe9   : > { %v298_v2 = vpop.xlane.xlu0 %297 }
  0xea   : > { %v300_v3 = vmul.f32 0.03125, %v298_v2 }
  0xec   : > { %v301_v4 = vsub.f32 %v294_v0, %v300_v3 }
  0xee   : > { %v302_v5 = vmul.f32 %v301_v4, %v301_v4 }
  0xf0   : > { %v303_v6 = vsel %vm295_vm0, %v302_v5, 0.0 }
  0xf1   : > { %304 = vadd.xlane.f32.xlu0 %v303_v6 }
 0x17e   : > { %v305_v20 = vpop.xlane.xlu0 %304 }
 0x17f   : > { %v306_v21 = vmul.f32 0.03125, %v305_v20 }
 0x181   : > { %v307_v22 = vadd.f32 1e-05, %v306_v21 }
 0x183   : > { %735 = vrsqrt.f32 %v307_v22 }
 0x18d   : > { %v736_v23 = vpop.eup %735 }
 0x18e   : > { %v309_v24 = vmul.f32 %v736_v23, %v301_v4 }
 0x190   : > { %631 = vmatmul.mubr.msk.f32.vlgmr.msra.gmra.mrb[0].mxu0 %vm295_vm0, %v309_v24 }
 0x263   : > { %v399_v32 = vpop.f32.mrb[0].mxu0 }
 0x264   : > { %v400_v33 = vadd.f32 %v399_v32, %v323_v30  ;;  %v401_v34 = vpop.f32.mrb[1].mxu0 }
 0x265   : > { %v402_v35 = vadd.f32 %v401_v34, %v327_v31 }
 0x266   : > { %407 = vrot.lane.b32.xlu1 %v400_v33, %s948_s21  ;;  %405 = vst.msk [vmem:[%s279_s8] sm:$0xff] %vm404_vm1, %v400_v33 }
 0x267   : > { %808 = shalt.err (!%p805_p9)
}
 0x268   : > { %s809_s25 = scalar_lea.hbm %s1158_s29, 128  ;;  %s813_s9 = scalar_lea.hbm %s1280_s3, 256 }
 0x269   : > { %p810_p1 = scmp.ne.s32.totalorder %s1158_s29, %s809_s25  ;;  %p814_p3 = scmp.lt.u32.totalorder %s1158_s29, %s1280_s3 }
 0x26a   : > { %p815_p13 = scmp.lt.u32.totalorder %s813_s9, %s809_s25  ;;  %p817_p6 = scmp.lt.u32.totalorder %s809_s25, %s1158_s29 }
 0x26b   : > { %p811_p2 = pnand %p810_p1, %p1076_p10 }
 0x26c   : > { %p816_p4 = por %p815_p13, %p814_p3 }
 0x26d   : > { %p812_p7 = pneg %p811_p2 }
 0x26e   : > { %p818_p8 = por %p817_p6, %p816_p4 }
 0x270   : > { %p819_p12 = pnand %p818_p8, %p812_p7 }
 0x272   : > { %822 = shalt.err (!%p819_p12)
}
 0x273   : > { %654 = dma.vmem_to_hbm [thread:$0]  (%p1076_p10), %s1160_s6, 128, %s1158_s29, %s413_s12  }
 0x274   : > { %s293_s14 = scalar_lea.vmem [#allocation10], %s1132_s15  ;;  %s417_s10 = sand.u32 1, %s1013_s24  }
 0x275   : > { %411 = vst.msk [vmem:[%s293_s14] sm:$0xff] %vm404_vm1, %v402_v35  ;;  %s286_s16 = scalar_lea.vmem [#allocation8], %s1132_s15  ;;  %s465_s25 = sshll.u32 %s293_s14, 4  ;;  %s1203_s25 = int_to_ptr.vmem [resolvable:$true] %s465_s25 }
 0x276   : > { %s451_s26 = sshll.u32 %s286_s16, 4  ;;  %s1193_s9 = scalar_lea.hbm %s1281_s4, %s1151_s17  ;;  %s1195_s26 = int_to_ptr.vmem [resolvable:$true] %s451_s26 }
 0x277   : > { %s1201_s12 = scalar_lea.hbm %s1282_s5, %s1151_s17  ;;  %s1206_s24 = scalar_lea.sflag [#allocation9], %s417_s10 }
 0x278   : > { %s823_s15 = scalar_lea.vmem %s1195_s26, 128  ;;  %s950_s30 = smov [#allocation8]  }
 0x279   : > { %p824_p11 = scmp.ne.s32.totalorder %s1195_s26, %s823_s15  ;;  %s827_s21 = sshll.u32 %s950_s30, 4  ;;  %s828_s21 = int_to_ptr.vmem [resolvable:$false] %s827_s21 }
 0x27a   : > { %s829_s14 = scalar_lea.vmem %s828_s21, 256  ;;  %p830_p9 = scmp.lt.s32.totalorder %s1195_s26, %s828_s21 }
 0x27b   : > { %p825_p0 = pnand %p824_p11, %p1076_p10  ;;  %p831_p1 = scmp.lt.s32.totalorder %s829_s14, %s823_s15 }
 0x27d   : > { %p826_p5 = pneg %p825_p0  ;;  %p832_p2 = por %p831_p1, %p830_p9 }
 0x27f   : > { %p833_p7 = pnand %p832_p2, %p826_p5 }
 0x2d8   : > { %v408_v36 = vpop.permute.xlu1 %407 }
 0x2d9   : > { %410 = vst.msk [vmem:[%s286_s16] sm:$0xff] %vm404_vm1, %v408_v36 }
 0x2da   : > { %836 = shalt.err (!%p833_p7)
}
 0x2db   : > { %s837_s17 = scalar_lea.hbm %s1193_s9, 128  ;;  %s841_s28 = scalar_lea.hbm %s1281_s4, 256 }
 0x2dc   : > { %p838_p3 = scmp.ne.s32.totalorder %s1193_s9, %s837_s17  ;;  %p842_p6 = scmp.lt.u32.totalorder %s1193_s9, %s1281_s4 }
 0x2dd   : > { %p843_p8 = scmp.lt.u32.totalorder %s841_s28, %s837_s17  ;;  %p845_p11 = scmp.lt.u32.totalorder %s837_s17, %s1193_s9 }
 0x2de   : > { %p839_p13 = pnand %p838_p3, %p1076_p10 }
 0x2df   : > { %p844_p12 = por %p843_p8, %p842_p6 }
 0x2e0   : > { %p840_p4 = pneg %p839_p13 }
 0x2e1   : > { %p846_p0 = por %p845_p11, %p844_p12 }
 0x2e3   : > { %p847_p5 = pnand %p846_p0, %p840_p4 }
 0x2e5   : > { %850 = shalt.err (!%p847_p5)
}
 0x2e6   : > { %655 = dma.vmem_to_hbm [thread:$0]  (%p1076_p10), %s1195_s26, 128, %s1193_s9, %s1206_s24  }
 0x2e7   : > { %s851_s29 = scalar_lea.vmem %s1203_s25, 128  ;;  %s951_s15 = smov [#allocation10]  }
 0x2e8   : > { %p852_p9 = scmp.ne.s32.totalorder %s1203_s25, %s851_s29  ;;  %s855_s30 = sshll.u32 %s951_s15, 4  ;;  %s856_s30 = int_to_ptr.vmem [resolvable:$false] %s855_s30 }
 0x2e9   : > { %s857_s21 = scalar_lea.vmem %s856_s30, 256  ;;  %p858_p7 = scmp.lt.s32.totalorder %s1203_s25, %s856_s30 }
 0x2ea   : > { %p853_p1 = pnand %p852_p9, %p1076_p10  ;;  %p859_p3 = scmp.lt.s32.totalorder %s857_s21, %s851_s29 }
 0x2ec   : > { %p854_p2 = pneg %p853_p1  ;;  %p860_p13 = por %p859_p3, %p858_p7 }
 0x2ee   : > { %p861_p4 = pnand %p860_p13, %p854_p2 }
 0x2f0   : > { %864 = shalt.err (!%p861_p4)
}
 0x2f1   : > { %s865_s26 = scalar_lea.hbm %s1201_s12, 128  ;;  %s869_s17 = scalar_lea.hbm %s1282_s5, 256 }
 0x2f2   : > { %p866_p6 = scmp.ne.s32.totalorder %s1201_s12, %s865_s26  ;;  %p870_p11 = scmp.lt.u32.totalorder %s1201_s12, %s1282_s5 }
 0x2f3   : > { %p871_p0 = scmp.lt.u32.totalorder %s869_s17, %s865_s26  ;;  %p873_p9 = scmp.lt.u32.totalorder %s865_s26, %s1201_s12 }
 0x2f4   : > { %p867_p8 = pnand %p866_p6, %p1076_p10 }
 0x2f5   : > { %p872_p5 = por %p871_p0, %p870_p11 }
 0x2f6   : > { %p868_p12 = pneg %p867_p8 }
 0x2f7   : > { %p874_p1 = por %p873_p9, %p872_p5 }
 0x2f9   : > { %p875_p2 = pnand %p874_p1, %p868_p12 }
 0x2fb   : > { %878 = shalt.err (!%p875_p2)
}
 0x2fc   : > { %656 = dma.vmem_to_hbm [thread:$0]  (%p1076_p10), %s1203_s25, 128, %s1201_s12, %s1206_s24  }
 0x2fd PF: > { %s477_s28 = sand.u32 1, %s921_s18   ;;  %p1299_p7 = scmp.ne.s32.totalorder %s1288_s27, 0 }
 0x2fe   : > { %p1300_p3 = scmp.ge.s32.totalorder %s941_s23, 2  ;;  %s478_s8 = scalar_lea.sflag [#allocation4], %s477_s28 }
 0x300   : > { %p669_p13 = pnand %p1300_p3, %p1299_p7 }
 0x302   : > { %912 = dma.done.wait (!%p669_p13), %s478_s8, 128  }
 0x303   : > { %914 = vsyncadd (!%p669_p13), %s478_s8, 4294967168  ;;  %s1301_s6 = sadd.s32 4294967294, %s941_s23  }
 0x304   : > { %s486_s29 = sand.u32 1, %s1301_s6  }
 0x305   : > { %s487_s15 = scalar_lea.sflag [#allocation9], %s486_s29 }
 0x306   : > { %916 = dma.done.wait (!%p669_p13), %s487_s15, 256  }
 0x307   : > { %918 = vsyncadd (!%p669_p13), %s487_s15, 4294967040  ;;  %s26_s23 = sadd.s32 1, %s941_s23   ;;  %s1302_s18 = smov %s925_s19 }
 0x308   : > { %p23_p10 = scmp.ge.s32.totalorder %s26_s23, 4   ;;  %s1303_s19 = smov %s929_s20 }
 0x309   : > { %s1304_s20 = smov %s1085_s13  ;;  %s1305_s21 = smov %s937_s22 }
 0x30a   : > { %s1306_s22 = smov %s1308_s7  ;;  %25 = sbr.rel (!%p23_p10) target bundleno = 9 (0x9), region = 113 }
 0x311   :  { %501 = vsyncpa [#allocation3], 1 }
 0x312   :  { %503 = vsyncpa [#allocation3 + $0x1], 1 }
 0x313   :  { %504 = vsyncpa [#allocation6], 1 }
 0x314   :  { %505 = vsyncpa [#allocation4], 1 }
 0x315   :  { %507 = vsyncpa [#allocation4 + $0x1], 1 }
 0x316   :  { %508 = vsyncpa [#allocation9], 1 }
 0x317   :  { %510 = vsyncpa [#allocation9 + $0x1], 1 }

// kernel: tpu_custom_call.1
= control target key start
LH: loop header
LB: loop body
LE: loop exit
PB: predicated region body
PF: predicated region fallthrough
CT: control target
= control target key end

     0   :  { %11 = vsyncpa [#allocation3], 0  ;;  %s1277_s0 = inlined_call_operand.hbm [shape: f32[2,8,32], index: 0, kind: input, shape index: {}]   ;;  %s1278_s1 = inlined_call_operand.hbm [shape: f32[32,192], index: 1, kind: input, shape index: {}]   ;;  %s1279_s2 = inlined_call_operand.vmem [shape: f32[1,192], index: 2, kind: input, shape index: {}]   ;;  %s1280_s3 = inlined_call_operand.hbm [shape: f32[2,8,64], index: 3, kind: output, shape index: {0}]   ;;  %s1281_s4 = inlined_call_operand.hbm [shape: f32[2,8,64], index: 4, kind: output, shape index: {1}]   ;;  %s1282_s5 = inlined_call_operand.hbm [shape: f32[2,8,64], index: 5, kind: output, shape index: {2}]  }
   0x1   :  { %13 = vsyncpa [#allocation3 + $0x1], 0 }
   0x2   :  { %14 = vsyncpa [#allocation6], 0 }
   0x3   :  { %15 = vsyncpa [#allocation4], 0 }
   0x4   :  { %17 = vsyncpa [#allocation4 + $0x1], 0 }
   0x5   :  { %18 = vsyncpa [#allocation9], 0 }
   0x6   :  { %20 = vsyncpa [#allocation9 + $0x1], 0  ;;  %s982_s18 = smov 0   ;;  %s984_s19 = smov 0  }
   0x7   :  { %s986_s20 = smov 0   ;;  %s988_s21 = smov 0  }
   0x8   :  { %s990_s22 = smov 0   ;;  %s992_s23 = smov 0  }
   0x9 LB: > { %s1013_s24 = sadd.s32 4294967295, %s941_s23   ;;  %s1286_s25 = sadd.s32 4294967294, %s941_s23   ;;  %s941_s23 = sphi %s992_s23, %s26_s23   ;;  %s937_s22 = sphi %s990_s22, %s1306_s22   ;;  %s933_s21 = sphi %s988_s21, %s1305_s21   ;;  %s929_s20 = sphi %s986_s20, %s1304_s20   ;;  %s925_s19 = sphi %s984_s19, %s1303_s19   ;;  %s921_s18 = sphi %s982_s18, %s1302_s18  }
   0xa   : > { %p60_p0 = scmp.ne.s32.totalorder %s925_s19, %s921_s18  ;;  %p1283_p1 = scmp.eq.s32.totalorder %s1013_s24, 0 }
   0xb   : > { %p134_p3 = scmp.eq.s32.totalorder %s1286_s25, 1  ;;  %p620_p5 = scmp.ge.s32.totalorder %s941_s23, 1 }
   0xc   : > { %p1024_p4 = por %p1283_p1, %p60_p0  ;;  %p197_p7 = scmp.lt.s32.totalorder %s941_s23, 3 }
   0xd   : > { %p1029_p6 = por %p134_p3, %p60_p0  ;;  %s943_s29 = smov [#allocation5]  }
   0xe   : > { %s1287_s26 = scalar_select %p1024_p4, 1, 0 }
   0xf   : > { %s1288_s27 = scalar_select %p1029_p6, 1, 0 }
  0x10   : > { %p1034_p8 = pnand %p620_p5, %p197_p7  ;;  %s209_s30 = sshll.u32 %s943_s29, 4  ;;  %s210_s30 = int_to_ptr.vmem [resolvable:$true] %s209_s30 }
  0x11   : > { %s38_s7 = sadd.s32 1, %s937_s22  ;;  %s737_s10 = scalar_lea.hbm %s1278_s1, 1024 }
  0x12   : > { %s1289_s28 = scalar_select %p1034_p8, 1, 0 }
  0x13   : > { %p660_p9 = pneg %p1034_p8  ;;  %p738_p12 = scmp.ne.s32.totalorder %s1278_s1, %s737_s10 }
  0x14   : > { %p744_p5 = scmp.lt.u32.totalorder %s737_s10, %s1278_s1 }
  0x15   : > { %p1043_p11 = pnand %p660_p9, %p1283_p1 }
  0x17   : > { %p739_p13 = pneg %p1043_p11 }
  0x19   : > { %p740_p0 = pnand %p739_p13, %p738_p12 }
  0x1b   : > { %p741_p3 = pneg %p740_p0 }
  0x1d   : > { %p746_p7 = pnand %p744_p5, %p741_p3 }
  0x1f   : > { %749 = shalt.err (!%p746_p7)
}
  0x20   : > { %s750_s15 = scalar_lea.vmem %s210_s30, 1024  ;;  %p758_p2 = scmp.lt.s32.totalorder %s210_s30, %s210_s30 }
  0x21   : > { %p751_p9 = scmp.ne.s32.totalorder %s210_s30, %s750_s15  ;;  %p759_p6 = scmp.lt.s32.totalorder %s750_s15, %s750_s15 }
  0x23   : > { %p753_p10 = pnand %p751_p9, %p739_p13  ;;  %p760_p4 = por %p759_p6, %p758_p2 }
  0x25   : > { %p754_p1 = pneg %p753_p10 }
  0x27   : > { %p761_p8 = pnand %p760_p4, %p754_p1 }
  0x29   : > { %764 = shalt.err (!%p761_p8)
}
  0x2a   : > { %s944_s16 = smov 256   ;;  %s945_s17 = smov 16  }
  0x2b   : > { %663 = dma.hbm_to_vmem [thread:$0]  (!%p1043_p11), %s1278_s1, 1024, %s210_s30, [#allocation6], %s944_s16, %s944_s16, %s945_s17  }
  0x2c   : > { %p40_p1 = scmp.ge.s32.totalorder %s38_s7, 2  ;;  %s47_s9 = sadd.s32 1, %s929_s20 }
  0x2d   : > { %p54_p2 = scmp.ne.s32.totalorder %s929_s20, %s925_s19  ;;  %p55_p4 = scmp.eq.s32.totalorder %s941_s23, 0 }
  0x2e   : > { %s1308_s7 = smov (%p40_p1, %s38_s7), 0  ;;  %p1292_p8 = scmp.eq.s32.totalorder %s1013_s24, 1 }
  0x2f   : > { %p1070_p6 = por %p55_p4, %p54_p2  ;;  %s42_s6 = ssub.s32 %s937_s22, %s1308_s7 }
  0x30   : > { %p1076_p10 = por %p1292_p8, %p54_p2  ;;  %p679_p12 = scmp.lt.s32.totalorder %s941_s23, 2 }
  0x31   : > { %p45_p11 = scmp.eq.s32.totalorder %s42_s6, 0  ;;  %s226_s30 = sand.u32 1, %s929_s20  }
  0x32   : > { %s623_s12 = sshll.u32 %s226_s30, 3  ;;  %s624_s14 = sshll.u32 %s937_s22, 7 }
  0x33   : > { %s1085_s13 = scalar_select %p45_p11, %s929_s20, %s47_s9  }
  0x34   : > { %s1091_s17 = scalar_lea.hbm %s1277_s0, %s624_s14  ;;  %s230_s29 = scalar_lea.vmem [#allocation2], %s623_s12 }
  0x35   : > { %s238_s8 = sshll.u32 %s230_s29, 4  ;;  %p1097_p13 = pnand %p679_p12, %p1070_p6  ;;  %s1093_s8 = int_to_ptr.vmem [resolvable:$true] %s238_s8 }
  0x36   : > { %s227_s9 = scalar_lea.sflag [#allocation3], %s226_s30  ;;  %s765_s25 = scalar_lea.hbm %s1091_s17, 128 }
  0x37   : > { %p766_p0 = scmp.ne.s32.totalorder %s1091_s17, %s765_s25  ;;  %p767_p3 = pneg %p1097_p13 }
  0x38   : > { %s770_s15 = scalar_lea.hbm %s1277_s0, 256  ;;  %p771_p9 = scmp.lt.u32.totalorder %s1091_s17, %s1277_s0 }
  0x39   : > { %p768_p5 = pnand %p767_p3, %p766_p0  ;;  %p772_p1 = scmp.lt.u32.totalorder %s770_s15, %s765_s25 }
  0x3a   : > { %p774_p4 = scmp.lt.u32.totalorder %s765_s25, %s1091_s17 }
  0x3b   : > { %p769_p7 = pneg %p768_p5  ;;  %p773_p2 = por %p772_p1, %p771_p9 }
  0x3d   : > { %p775_p6 = por %p774_p4, %p773_p2 }
  0x3f   : > { %p776_p8 = pnand %p775_p6, %p769_p7 }
  0x41   : > { %779 = shalt.err (!%p776_p8)
}
  0x42   : > { %s780_s30 = scalar_lea.vmem %s1093_s8, 128  ;;  %s946_s29 = smov [#allocation2]  }
  0x43   : > { %p781_p12 = scmp.ne.s32.totalorder %s1093_s8, %s780_s30  ;;  %s785_s12 = sshll.u32 %s946_s29, 4  ;;  %s786_s12 = int_to_ptr.vmem [resolvable:$false] %s785_s12 }
  0x44   : > { %s787_s14 = scalar_lea.vmem %s786_s12, 256  ;;  %p788_p5 = scmp.lt.s32.totalorder %s1093_s8, %s786_s12 }
  0x45   : > { %p783_p11 = pnand %p781_p12, %p767_p3  ;;  %p789_p9 = scmp.lt.s32.totalorder %s787_s14, %s780_s30 }
  0x47   : > { %p784_p0 = pneg %p783_p11  ;;  %p790_p1 = por %p789_p9, %p788_p5 }
  0x49   : > { %p791_p2 = pnand %p790_p1, %p784_p0 }
  0x4b   : > { %794 = shalt.err (!%p791_p2)
}
  0x4c   : > { %667 = dma.hbm_to_vmem [thread:$0]  (!%p1097_p13), %s1091_s17, 128, %s1093_s8, %s227_s9  }
  0x4d   : > { %p1295_p7 = scmp.ne.s32.totalorder %s1289_s28, 0 }
  0x4e   : > { %s1129_s25 = sand.u32 (!%p1295_p7), 1, %s925_s19   ;;  %p1296_p3 = scmp.ne.s32.totalorder (!%p1295_p7), %s1287_s26, 0 }
  0x4f   : > { %247 = sbr.rel (%p1295_p7) target bundleno = 765 (0x2fd), region = 32  ;;  %s1132_s15 = sshll.u32 (!%p1295_p7), %s1129_s25, 3 }
  0x50   : > { %s250_s10 = scalar_lea.sflag (!%p1295_p7), [#allocation3], %s1129_s25  ;;  %s253_s16 = scalar_lea.vmem (!%p1295_p7), [#allocation2], %s1132_s15 }
  0x56   : > { %904 = dma.done.wait (%p1296_p3), %s250_s10, 128  }
  0x57   : > { %906 = vsyncadd (%p1296_p3), %s250_s10, 4294967168  ;;  %p1297_p13 = scmp.eq.s32.totalorder %s1013_s24, 0 }
  0x59   : > { %908 = dma.done.wait (%p1297_p13), [#allocation6], 1024   ;;  %p1298_p4 = pmov %p1297_p13 }
  0x5a   : > { %vm295_vm0 = vcmask 261120   ;;  %v294_v0 = vld [vmem:[%s253_s16] sm:$0xff]  ;;  %v311_v7 = vld [vmem:[#allocation5 + $0x8] sm:$0xff]  ;;  %v310_v9 = vld [vmem:[#allocation5] sm:$0xff]  ;;  %v947_v14 = vmov 0.0   ;;  %v320_v25 = vlaneseq  ;;  %s1151_s17 = sshll.u32 %s933_s21, 7 }
  0x5b   : > { %910 = vsyncadd (%p1298_p4), [#allocation6], 4294966272  ;;  %v296_v1 = vsel %vm295_vm0, %v294_v0, 0.0  ;;  %v313_v8 = vld [vmem:[#allocation5 + $0x18] sm:$0xff]  ;;  %v312_v11 = vld [vmem:[#allocation5 + $0x10] sm:$0xff]  ;;  %397 = vmatprep.mubr.f32.mxu0 %v947_v14  ;;  %s279_s8 = scalar_lea.vmem [#allocation7], %s1132_s15  ;;  %s1158_s29 = scalar_lea.hbm %s1280_s3, %s1151_s17 }
  0x5c   : > { %297 = vadd.xlane.f32.xlu0 %v296_v1  ;;  %v640_v10 = vpack.c.bf16 %v313_v8, %v311_v7  ;;  %v315_v12 = vld [vmem:[#allocation5 + $0x28] sm:$0xff]  ;;  %v317_v13 = vld [vmem:[#allocation5 + $0x38] sm:$0xff]  ;;  %v642_v15 = vpack.c.bf16 %v312_v11, %v310_v9  ;;  %v314_v17 = vld [vmem:[#allocation5 + $0x20] sm:$0xff]  ;;  %v321_v26 = vshrl.u32 %v320_v25, 7  ;;  %s437_s6 = sshll.u32 %s279_s8, 4  ;;  %vm404_vm1 = vcmask 523264   ;;  %s1160_s6 = int_to_ptr.vmem [resolvable:$true] %s437_s6 }
  0x5d   : > { %v644_v16 = vpack.c.bf16 %v317_v13, %v315_v12  ;;  %v316_v18 = vld [vmem:[#allocation5 + $0x30] sm:$0xff]  ;;  %s948_s21 = smov 64   ;;  %s413_s12 = scalar_lea.sflag [#allocation4], %s1129_s25 }
  0x5e   : > { %641 = vmatprep.subr.bf16.mxu0 %v640_v10  ;;  %v646_v19 = vpack.c.bf16 %v316_v18, %v314_v17  ;;  %v322_v27 = vsub.s32 0, %v321_v26  ;;  %v318_v28 = vld [vmem:[%s1279_s2] sm:$0x3]  ;;  %v326_v29 = vsub.s32 1, %v321_v26  ;;  %s795_s14 = scalar_lea.vmem %s1160_s6, 128  ;;  %s949_s10 = smov [#allocation7]  }
  0x5f   : > { %643 = vmatpush1.bf16.msra.mxu0 %v642_v15  ;;  %p796_p6 = scmp.ne.s32.totalorder %s1160_s6, %s795_s14  ;;  %s799_s16 = sshll.u32 %s949_s10, 4  ;;  %s800_s16 = int_to_ptr.vmem [resolvable:$false] %s799_s16 }
  0x60   : > { %645 = vmatprep.subr.bf16.mxu0 %v644_v16  ;;  %v323_v30 = vrot.slane %v318_v28, %v322_v27  ;;  %v327_v31 = vrot.slane %v318_v28, %v326_v29  ;;  %s801_s26 = scalar_lea.vmem %s800_s16, 256  ;;  %p802_p11 = scmp.lt.s32.totalorder %s1160_s6, %s800_s16 }
  0x61   : > { %p797_p8 = pnand %p796_p6, %p1076_p10  ;;  %p803_p0 = scmp.lt.s32.totalorder %s801_s26, %s795_s14 }
  0x63   : > { %647 = vmatpush1.bf16.msra.mxu0 %v646_v19  ;;  %p798_p12 = pneg %p797_p8  ;;  %p804_p5 = por %p803_p0, %p802_p11 }
  0x65   : > { %p805_p9 = pnand %p804_p5, %p798_p12 }
  0xe9   : > { %v298_v2 = vpop.xlane.xlu0 %297 }
  0xea   : > { %v300_v3 = vmul.f32 0.03125, %v298_v2 }
  0xec   : > { %v301_v4 = vsub.f32 %v294_v0, %v300_v3 }
  0xee   : > { %v302_v5 = vmul.f32 %v301_v4, %v301_v4 }
  0xf0   : > { %v303_v6 = vsel %vm295_vm0, %v302_v5, 0.0 }
  0xf1   : > { %304 = vadd.xlane.f32.xlu0 %v303_v6 }
 0x17e   : > { %v305_v20 = vpop.xlane.xlu0 %304 }
 0x17f   : > { %v306_v21 = vmul.f32 0.03125, %v305_v20 }
 0x181   : > { %v307_v22 = vadd.f32 1e-05, %v306_v21 }
 0x183   : > { %735 = vrsqrt.f32 %v307_v22 }
 0x18d   : > { %v736_v23 = vpop.eup %735 }
 0x18e   : > { %v309_v24 = vmul.f32 %v736_v23, %v301_v4 }
 0x190   : > { %631 = vmatmul.mubr.msk.f32.vlgmr.msra.gmra.mrb[0].mxu0 %vm295_vm0, %v309_v24 }
 0x263   : > { %v399_v32 = vpop.f32.mrb[0].mxu0 }
 0x264   : > { %v400_v33 = vadd.f32 %v399_v32, %v323_v30  ;;  %v401_v34 = vpop.f32.mrb[1].mxu0 }
 0x265   : > { %v402_v35 = vadd.f32 %v401_v34, %v327_v31 }
 0x266   : > { %407 = vrot.lane.b32.xlu1 %v400_v33, %s948_s21  ;;  %405 = vst.msk [vmem:[%s279_s8] sm:$0xff] %vm404_vm1, %v400_v33 }
 0x267   : > { %808 = shalt.err (!%p805_p9)
}
 0x268   : > { %s809_s25 = scalar_lea.hbm %s1158_s29, 128  ;;  %s813_s9 = scalar_lea.hbm %s1280_s3, 256 }
 0x269   : > { %p810_p1 = scmp.ne.s32.totalorder %s1158_s29, %s809_s25  ;;  %p814_p3 = scmp.lt.u32.totalorder %s1158_s29, %s1280_s3 }
 0x26a   : > { %p815_p13 = scmp.lt.u32.totalorder %s813_s9, %s809_s25  ;;  %p817_p6 = scmp.lt.u32.totalorder %s809_s25, %s1158_s29 }
 0x26b   : > { %p811_p2 = pnand %p810_p1, %p1076_p10 }
 0x26c   : > { %p816_p4 = por %p815_p13, %p814_p3 }
 0x26d   : > { %p812_p7 = pneg %p811_p2 }
 0x26e   : > { %p818_p8 = por %p817_p6, %p816_p4 }
 0x270   : > { %p819_p12 = pnand %p818_p8, %p812_p7 }
 0x272   : > { %822 = shalt.err (!%p819_p12)
}
 0x273   : > { %654 = dma.vmem_to_hbm [thread:$0]  (%p1076_p10), %s1160_s6, 128, %s1158_s29, %s413_s12  }
 0x274   : > { %s293_s14 = scalar_lea.vmem [#allocation10], %s1132_s15  ;;  %s417_s10 = sand.u32 1, %s1013_s24  }
 0x275   : > { %411 = vst.msk [vmem:[%s293_s14] sm:$0xff] %vm404_vm1, %v402_v35  ;;  %s286_s16 = scalar_lea.vmem [#allocation8], %s1132_s15  ;;  %s465_s25 = sshll.u32 %s293_s14, 4  ;;  %s1203_s25 = int_to_ptr.vmem [resolvable:$true] %s465_s25 }
 0x276   : > { %s451_s26 = sshll.u32 %s286_s16, 4  ;;  %s1193_s9 = scalar_lea.hbm %s1281_s4, %s1151_s17  ;;  %s1195_s26 = int_to_ptr.vmem [resolvable:$true] %s451_s26 }
 0x277   : > { %s1201_s12 = scalar_lea.hbm %s1282_s5, %s1151_s17  ;;  %s1206_s24 = scalar_lea.sflag [#allocation9], %s417_s10 }
 0x278   : > { %s823_s15 = scalar_lea.vmem %s1195_s26, 128  ;;  %s950_s30 = smov [#allocation8]  }
 0x279   : > { %p824_p11 = scmp.ne.s32.totalorder %s1195_s26, %s823_s15  ;;  %s827_s21 = sshll.u32 %s950_s30, 4  ;;  %s828_s21 = int_to_ptr.vmem [resolvable:$false] %s827_s21 }
 0x27a   : > { %s829_s14 = scalar_lea.vmem %s828_s21, 256  ;;  %p830_p9 = scmp.lt.s32.totalorder %s1195_s26, %s828_s21 }
 0x27b   : > { %p825_p0 = pnand %p824_p11, %p1076_p10  ;;  %p831_p1 = scmp.lt.s32.totalorder %s829_s14, %s823_s15 }
 0x27d   : > { %p826_p5 = pneg %p825_p0  ;;  %p832_p2 = por %p831_p1, %p830_p9 }
 0x27f   : > { %p833_p7 = pnand %p832_p2, %p826_p5 }
 0x2d8   : > { %v408_v36 = vpop.permute.xlu1 %407 }
 0x2d9   : > { %410 = vst.msk [vmem:[%s286_s16] sm:$0xff] %vm404_vm1, %v408_v36 }
 0x2da   : > { %836 = shalt.err (!%p833_p7)
}
 0x2db   : > { %s837_s17 = scalar_lea.hbm %s1193_s9, 128  ;;  %s841_s28 = scalar_lea.hbm %s1281_s4, 256 }
 0x2dc   : > { %p838_p3 = scmp.ne.s32.totalorder %s1193_s9, %s837_s17  ;;  %p842_p6 = scmp.lt.u32.totalorder %s1193_s9, %s1281_s4 }
 0x2dd   : > { %p843_p8 = scmp.lt.u32.totalorder %s841_s28, %s837_s17  ;;  %p845_p11 = scmp.lt.u32.totalorder %s837_s17, %s1193_s9 }
 0x2de   : > { %p839_p13 = pnand %p838_p3, %p1076_p10 }
 0x2df   : > { %p844_p12 = por %p843_p8, %p842_p6 }
 0x2e0   : > { %p840_p4 = pneg %p839_p13 }
 0x2e1   : > { %p846_p0 = por %p845_p11, %p844_p12 }
 0x2e3   : > { %p847_p5 = pnand %p846_p0, %p840_p4 }
 0x2e5   : > { %850 = shalt.err (!%p847_p5)
}
 0x2e6   : > { %655 = dma.vmem_to_hbm [thread:$0]  (%p1076_p10), %s1195_s26, 128, %s1193_s9, %s1206_s24  }
 0x2e7   : > { %s851_s29 = scalar_lea.vmem %s1203_s25, 128  ;;  %s951_s15 = smov [#allocation10]  }
 0x2e8   : > { %p852_p9 = scmp.ne.s32.totalorder %s1203_s25, %s851_s29  ;;  %s855_s30 = sshll.u32 %s951_s15, 4  ;;  %s856_s30 = int_to_ptr.vmem [resolvable:$false] %s855_s30 }
 0x2e9   : > { %s857_s21 = scalar_lea.vmem %s856_s30, 256  ;;  %p858_p7 = scmp.lt.s32.totalorder %s1203_s25, %s856_s30 }
 0x2ea   : > { %p853_p1 = pnand %p852_p9, %p1076_p10  ;;  %p859_p3 = scmp.lt.s32.totalorder %s857_s21, %s851_s29 }
 0x2ec   : > { %p854_p2 = pneg %p853_p1  ;;  %p860_p13 = por %p859_p3, %p858_p7 }
 0x2ee   : > { %p861_p4 = pnand %p860_p13, %p854_p2 }
 0x2f0   : > { %864 = shalt.err (!%p861_p4)
}
 0x2f1   : > { %s865_s26 = scalar_lea.hbm %s1201_s12, 128  ;;  %s869_s17 = scalar_lea.hbm %s1282_s5, 256 }
 0x2f2   : > { %p866_p6 = scmp.ne.s32.totalorder %s1201_s12, %s865_s26  ;;  %p870_p11 = scmp.lt.u32.totalorder %s1201_s12, %s1282_s5 }
 0x2f3   : > { %p871_p0 = scmp.lt.u32.totalorder %s869_s17, %s865_s26  ;;  %p873_p9 = scmp.lt.u32.totalorder %s865_s26, %s1201_s12 }
 0x2f4   : > { %p867_p8 = pnand %p866_p6, %p1076_p10 }
 0x2f5   : > { %p872_p5 = por %p871_p0, %p870_p11 }
 0x2f6   : > { %p868_p12 = pneg %p867_p8 }
 0x2f7   : > { %p874_p1 = por %p873_p9, %p872_p5 }
 0x2f9   : > { %p875_p2 = pnand %p874_p1, %p868_p12 }
 0x2fb   : > { %878 = shalt.err (!%p875_p2)
}
 0x2fc   : > { %656 = dma.vmem_to_hbm [thread:$0]  (%p1076_p10), %s1203_s25, 128, %s1201_s12, %s1206_s24  }
 0x2fd PF: > { %s477_s28 = sand.u32 1, %s921_s18   ;;  %p1299_p7 = scmp.ne.s32.totalorder %s1288_s27, 0 }
 0x2fe   : > { %p1300_p3 = scmp.ge.s32.totalorder %s941_s23, 2  ;;  %s478_s8 = scalar_lea.sflag [#allocation4], %s477_s28 }
 0x300   : > { %p669_p13 = pnand %p1300_p3, %p1299_p7 }
 0x302   : > { %912 = dma.done.wait (!%p669_p13), %s478_s8, 128  }
 0x303   : > { %914 = vsyncadd (!%p669_p13), %s478_s8, 4294967168  ;;  %s1301_s6 = sadd.s32 4294967294, %s941_s23  }
 0x304   : > { %s486_s29 = sand.u32 1, %s1301_s6  }
 0x305   : > { %s487_s15 = scalar_lea.sflag [#allocation9], %s486_s29 }
 0x306   : > { %916 = dma.done.wait (!%p669_p13), %s487_s15, 256  }
 0x307   : > { %918 = vsyncadd (!%p669_p13), %s487_s15, 4294967040  ;;  %s26_s23 = sadd.s32 1, %s941_s23   ;;  %s1302_s18 = smov %s925_s19 }
 0x308   : > { %p23_p10 = scmp.ge.s32.totalorder %s26_s23, 4   ;;  %s1303_s19 = smov %s929_s20 }
 0x309   : > { %s1304_s20 = smov %s1085_s13  ;;  %s1305_s21 = smov %s937_s22 }
 0x30a   : > { %s1306_s22 = smov %s1308_s7  ;;  %25 = sbr.rel (!%p23_p10) target bundleno = 9 (0x9), region = 113 }
 0x311   :  { %501 = vsyncpa [#allocation3], 1 }
 0x312   :  { %503 = vsyncpa [#allocation3 + $0x1], 1 }
 0x313   :  { %504 = vsyncpa [#allocation6], 1 }
 0x314   :  { %505 = vsyncpa [#allocation4], 1 }
 0x315   :  { %507 = vsyncpa [#allocation4 + $0x1], 1 }
 0x316   :  { %508 = vsyncpa [#allocation9], 1 }
 0x317   :  { %510 = vsyncpa [#allocation9 + $0x1], 1 }

</bundles_post_ra>
